<compile_context>
chip_gen: v5e
topology: v5e:2x2
jax: 0.10.0
libtpu: 0.0.40
codegen_flags: <defaults>
</compile_context>

<pallas_src>
import functools

import jax
import jax.numpy as jnp
import numpy as np
from jax.experimental import pallas as pl
from jax.experimental.pallas import tpu as pltpu

_LANE = 128


def _round_up(n, m):
    return ((n + m - 1) // m) * m


# ----------------------------- Pallas kernels ------------------------------ #

def _cam_fused_kernel(g_ref, x_ref, o_ref):
    """Single-pass CAM for one batch group resident in VMEM."""
    x = x_ref[...].astype(jnp.float32)                        # (bt, C, HWp)
    # Gram matrix: contract the lane (HW) dim of both operands (X @ X^T).
    energy = jnp.einsum('bcm,bdm->bcd', x, x,
                        preferred_element_type=jnp.float32)   # (bt, C, C)
    # Stable softmax: softmax(rowmax(E)-E) == exp(rowmin(E)-E)/sum (max exp arg = 0).
    p = jnp.exp(jnp.min(energy, axis=-1, keepdims=True) - energy)
    attn = p / jnp.sum(p, axis=-1, keepdims=True)
    ctx = jnp.einsum('bcd,bdm->bcm', attn, x,
                     preferred_element_type=jnp.float32)      # (bt, C, HWp)
    o_ref[...] = (g_ref[0] * ctx + x).astype(o_ref.dtype)


def _cam_attention_kernel(x_ref, attn_ref):
    """Pass 1: accumulate energy = X @ X^T over HW tiles; stable softmax at end.

    attn_ref (same block index across the HW grid axis) doubles as the f32
    accumulator, so no extra VMEM scratch is needed.
    """
    hw_i = pl.program_id(1)

    @pl.when(hw_i == 0)
    def _init():
        attn_ref[...] = jnp.zeros_like(attn_ref)

    xt = x_ref[...].astype(jnp.float32)                       # (bt, C, hw_tile)
    attn_ref[...] += jnp.einsum('bcm,bdm->bcd', xt, xt,
                                preferred_element_type=jnp.float32)

    @pl.when(hw_i == pl.num_programs(1) - 1)
    def _finalize():
        energy = attn_ref[...]
        p = jnp.exp(jnp.min(energy, axis=-1, keepdims=True) - energy)
        attn_ref[...] = p / jnp.sum(p, axis=-1, keepdims=True)


def _cam_apply_kernel(g_ref, attn_ref, x_ref, o_ref):
    """Pass 2: out_tile = gamma * (attention @ X_tile) + X_tile, fully fused."""
    xt = x_ref[...].astype(jnp.float32)                       # (bt, C, hw_tile)
    ctx = jnp.einsum('bcd,bdm->bcm', attn_ref[...], xt,
                     preferred_element_type=jnp.float32)
    o_ref[...] = (g_ref[0] * ctx + xt).astype(o_ref.dtype)


# ------------------------------ sizing helpers ------------------------------ #

def _vmem_capacity_bytes():
    try:
        return int(pltpu.get_tpu_info().vmem_capacity_bytes)
    except Exception:
        return 64 << 20            # conservative fallback (v7x per-TC VMEM)


def _vmem_limit(nbytes_needed, cap):
    ceiling = max(cap - (16 << 20), 32 << 20)        # leave Mosaic headroom
    return int(min(max(nbytes_needed + (4 << 20), 32 << 20), ceiling))


def _pick_hw_tile(hw_p, cap):
    # v5e/v6e (128 MiB VMEM): up to 2048 lanes; v7x (64 MiB): cap at 1024.
    max_tile = 2048 if cap >= (100 << 20) else 1024
    t = min(max_tile, hw_p)
    while hw_p % t != 0:
        t -= _LANE
    return t


def _pick_b_tile(b, c):
    # For small C, block several batch elements per grid step (fills MXU /
    # sublanes and amortizes the ~0.35 us per-step overhead).
    if c >= _LANE:
        return 1
    bt = min(b, max(1, _LANE // max(c, 1)))
    while b % bt != 0:
        bt -= 1
    return bt


# ------------------------------ JAX wrapper --------------------------------- #

@functools.partial(jax.jit, static_argnames=("force_two_pass", "hw_tile"))
def cam_forward(x_nchw, gamma, *, force_two_pass=False, hw_tile=None):
    """CAM forward: gamma * (channel-attention applied to x) + x, NCHW."""
    b, c, h, w = x_nchw.shape
    hw = h * w
    hw_p = _round_up(hw, _LANE)
    x3 = x_nchw.reshape(b, c, hw)
    if hw_p != hw:
        # Zero padding contributes 0 to the Gram matrix and to attention @ X;
        # padded columns are sliced off at the end.
        x3 = jnp.pad(x3, ((0, 0), (0, 0), (0, hw_p - hw)))
    gamma = jnp.asarray(gamma, jnp.float32).reshape(1)

    cap = _vmem_capacity_bytes()
    itemsize = 4

    # Fused single-pass footprint estimate (per grid step, b_tile = 1):
    # 2x double-buffered in + out slabs, f32 working copy + ctx, C*C temps.
    fused_need = itemsize * (6 * c * hw_p + 4 * c * c)
    fuse = (not force_two_pass) and fused_need <= max(cap - (24 << 20), 0)

    if fuse:
        out = pl.pallas_call(
            _cam_fused_kernel,
            out_shape=jax.ShapeDtypeStruct((b, c, hw_p), x_nchw.dtype),
            grid=(b,),
            in_specs=[
                pl.BlockSpec(memory_space=pltpu.MemorySpace.SMEM),      # gamma
                pl.BlockSpec((1, c, hw_p), lambda i: (i, 0, 0)),        # X slab
            ],
            out_specs=pl.BlockSpec((1, c, hw_p), lambda i: (i, 0, 0)),
            compiler_params=pltpu.CompilerParams(
                dimension_semantics=("parallel",),
                vmem_limit_bytes=_vmem_limit(fused_need, cap)),
            cost_estimate=pl.CostEstimate(
                flops=4 * b * c * c * hw_p + 3 * b * c * hw_p,
                transcendentals=b * c * c,
                bytes_accessed=itemsize * 2 * b * c * hw_p),
        )(gamma, x3)
    else:
        tile = (hw_tile if (hw_tile is not None and hw_p % hw_tile == 0)
                else _pick_hw_tile(hw_p, cap))
        n_hw = hw_p // tile
        bt = _pick_b_tile(b, c)
        nb = b // bt

        # ---- Pass 1: per-batch-group Gram + stable softmax -> (B, C, C) ---- #
        p1_need = itemsize * (3 * bt * c * tile + 6 * bt * c * c)
        attn = pl.pallas_call(
            _cam_attention_kernel,
            out_shape=jax.ShapeDtypeStruct((b, c, c), jnp.float32),
            grid=(nb, n_hw),
            in_specs=[pl.BlockSpec((bt, c, tile), lambda i, j: (i, 0, j))],
            out_specs=pl.BlockSpec((bt, c, c), lambda i, j: (i, 0, 0)),
            compiler_params=pltpu.CompilerParams(
                dimension_semantics=("parallel", "arbitrary"),
                vmem_limit_bytes=_vmem_limit(p1_need, cap)),
            cost_estimate=pl.CostEstimate(
                flops=2 * b * c * c * hw_p + 5 * b * c * c,
                transcendentals=b * c * c,
                bytes_accessed=itemsize * (b * c * hw_p + b * c * c)),
        )(x3)

        # ---- Pass 2: out = gamma * (attention @ X) + X, tiled over HW ------ #
        p2_need = itemsize * (5 * bt * c * tile + 2 * bt * c * c)
        out = pl.pallas_call(
            _cam_apply_kernel,
            out_shape=jax.ShapeDtypeStruct((b, c, hw_p), x_nchw.dtype),
            grid=(nb, n_hw),
            in_specs=[
                pl.BlockSpec(memory_space=pltpu.MemorySpace.SMEM),       # gamma
                pl.BlockSpec((bt, c, c), lambda i, j: (i, 0, 0)),        # attention
                pl.BlockSpec((bt, c, tile), lambda i, j: (i, 0, j)),     # X tile
            ],
            out_specs=pl.BlockSpec((bt, c, tile), lambda i, j: (i, 0, j)),
            compiler_params=pltpu.CompilerParams(
                dimension_semantics=("parallel", "parallel"),
                vmem_limit_bytes=_vmem_limit(p2_need, cap)),
            cost_estimate=pl.CostEstimate(
                flops=2 * b * c * c * hw_p + 3 * b * c * hw_p,
                transcendentals=0,
                bytes_accessed=itemsize * (2 * b * c * hw_p + b * c * c)),
        )(gamma, attn, x3)

    if hw_p != hw:
        out = out[:, :, :hw]
    return out.reshape(b, c, h, w)


# ------------------------------ reference ----------------------------------- #

def _ref_cam_f64(x_np, gamma):
    """float64 host reference (exact PyTorch semantics, stable softmax)."""
    x64 = np.asarray(x_np, np.float64)
    b, c, h, w = x64.shape
    q = x64.reshape(b, c, h * w)
    energy = q @ np.transpose(q, (0, 2, 1))
    e_new = energy.max(axis=-1, keepdims=True) - energy
    e_new = e_new - e_new.max(axis=-1, keepdims=True)
    p = np.exp(e_new)
    attn = p / p.sum(axis=-1, keepdims=True)
    out = (attn @ q).reshape(b, c, h, w)
    return gamma * out + x64


# --------------------------------- main -------------------------------------- #

if __name__ == "__main__":
    key = jax.random.PRNGKey(0)
    k1, k2, k3 = jax.random.split(key, 3)

    # Shapes implied by the module docstring: (batch, channels, H, W).
    x_small = jax.random.normal(k1, (2, 4, 16, 16), jnp.float32)
    x_ragged = jax.random.normal(k2, (2, 4, 10, 10), jnp.float32)   # HW=100 -> padded to 128
    x_large = jax.random.normal(k3, (2, 32, 32, 32), jnp.float32)   # HW=1024

    gamma_init = jnp.zeros((1,), jnp.float32)      # nn.Parameter(torch.zeros(1))
    gamma_live = jnp.full((1,), 0.5, jnp.float32)  # exercise the attention path

    tests = [
        (x_small, gamma_init, False, None),
        (x_small, gamma_live, False, None),
        (x_ragged, gamma_live, False, None),   # padding path
        (x_large, gamma_live, False, None),    # fused single-pass path
        (x_large, gamma_live, True, 256),      # two-pass path, 4-step HW accumulation
    ]

    for x, g, force, tile in tests:
        out = jax.block_until_ready(
            cam_forward(x, g, force_two_pass=force, hw_tile=tile))
        assert out.shape == x.shape and out.dtype == x.dtype
        ref = _ref_cam_f64(np.asarray(x), float(np.asarray(g)[0]))
        # Tolerance accounts for MXU f32-emulation of the Gram matmul being
        # amplified by the sharp channel softmax (reference is exact f64).
        np.testing.assert_allclose(np.asarray(out, np.float64), ref,
                                   rtol=2e-3, atol=2e-3)

    print("KERNEL_OK")
</pallas_src>

<mosaic_0001>
module attributes {stable_mosaic.version = 11 : i64} {
  func.func @_cam_fused_kernel(%arg0: i32, %arg1: memref<1xf32, #tpu.memory_space<smem>>, %arg2: memref<1x4x256xf32, #tpu.memory_space<vmem>>, %arg3: memref<1x4x256xf32, #tpu.memory_space<vmem>>) attributes {dimension_semantics = [#tpu.dimension_semantics<parallel>], iteration_bounds = array<i64: 2>, scalar_prefetch = 0 : i64, scratch_operands = 0 : i64, tpu.core_type = #tpu.core_type<tc>, window_params = [{transform_indices = @transform_0, window_bounds = array<i64: 1>}, {transform_indices = @transform_1, window_bounds = array<i64: 1, 4, 256>}, {transform_indices = @transform_2, window_bounds = array<i64: 1, 4, 256>}]} {
    %c0 = arith.constant 0 : index
    %c0_0 = arith.constant 0 : index
    %c0_1 = arith.constant 0 : index
    %0 = vector.load %arg2[%c0, %c0_0, %c0_1] : memref<1x4x256xf32, #tpu.memory_space<vmem>>, vector<1x4x256xf32>
    "tpu.trace_start"() <{level = 10 : i32, message = "bcm,bdm->bcd"}> : () -> ()
    %cst = arith.constant dense<0.000000e+00> : vector<1x4x4xf32>
    %1 = tpu.matmul %0, %0, %cst {dimension_numbers = #tpu.dot_dimension_numbers<[2], [2], [1], [1], [0, 0, 0, 1, 1, 1], [0], [0]>} : vector<1x4x256xf32>, vector<1x4x256xf32>, vector<1x4x4xf32> -> vector<1x4x4xf32>
    "tpu.trace_stop"() : () -> ()
    %cst_2 = arith.constant dense<0x7F800000> : vector<1x4xf32>
    %2 = vector.multi_reduction <minimumf>, %1, %cst_2 [2] : vector<1x4x4xf32> to vector<1x4xf32>
    %3 = vector.shape_cast %2 : vector<1x4xf32> to vector<1x4x1xf32>
    %4 = vector.broadcast %3 : vector<1x4x1xf32> to vector<1x4x4xf32>
    %5 = arith.subf %4, %1 : vector<1x4x4xf32>
    %6 = math.exp %5 : vector<1x4x4xf32>
    %cst_3 = arith.constant dense<0.000000e+00> : vector<1x4xf32>
    %7 = vector.multi_reduction <add>, %6, %cst_3 [2] : vector<1x4x4xf32> to vector<1x4xf32>
    %8 = vector.shape_cast %7 : vector<1x4xf32> to vector<1x4x1xf32>
    %9 = vector.broadcast %8 : vector<1x4x1xf32> to vector<1x4x4xf32>
    %10 = arith.divf %6, %9 : vector<1x4x4xf32>
    "tpu.trace_start"() <{level = 10 : i32, message = "bcd,bdm->bcm"}> : () -> ()
    %cst_4 = arith.constant dense<0.000000e+00> : vector<1x4x256xf32>
    %11 = tpu.matmul %10, %0, %cst_4 {dimension_numbers = #tpu.dot_dimension_numbers<[2], [1], [1], [2], [0, 0, 0, 1, 1, 2], [0], [0]>} : vector<1x4x4xf32>, vector<1x4x256xf32>, vector<1x4x256xf32> -> vector<1x4x256xf32>
    "tpu.trace_stop"() : () -> ()
    %c0_5 = arith.constant 0 : index
    %12 = memref.load %arg1[%c0_5] : memref<1xf32, #tpu.memory_space<smem>>
    %13 = vector.broadcast %12 : f32 to vector<1x4x256xf32>
    %14 = arith.mulf %13, %11 : vector<1x4x256xf32>
    %15 = arith.addf %14, %0 : vector<1x4x256xf32>
    %c0_6 = arith.constant 0 : index
    %c0_7 = arith.constant 0 : index
    %c0_8 = arith.constant 0 : index
    %16 = vector.load %arg3[%c0_6, %c0_7, %c0_8] : memref<1x4x256xf32, #tpu.memory_space<vmem>>, vector<1x4x256xf32>
    tpu.vector_store %arg3[%c0_6, %c0_7, %c0_8], %15 {strides = array<i32>} : memref<1x4x256xf32, #tpu.memory_space<vmem>>, vector<1x4x256xf32>,
    return
  }
  func.func @transform_0(%arg0: i32) -> i32 {
    %c0_i32 = arith.constant 0 : i32
    %c0_i32_0 = arith.constant 0 : i32
    return %c0_i32 : i32
  }
  func.func @transform_1(%arg0: i32) -> (i32, i32, i32) {
    %c0_i32 = arith.constant 0 : i32
    %c0_i32_0 = arith.constant 0 : i32
    %c0_i32_1 = arith.constant 0 : i32
    return %arg0, %c0_i32, %c0_i32_0 : i32, i32, i32
  }
  func.func @transform_2(%arg0: i32) -> (i32, i32, i32) {
    %c0_i32 = arith.constant 0 : i32
    %c0_i32_0 = arith.constant 0 : i32
    %c0_i32_1 = arith.constant 0 : i32
    return %arg0, %c0_i32, %c0_i32_0 : i32, i32, i32
  }
}

</mosaic_0001>

<bundles_post_ra>
// kernel: cam_forward.1
= control target key start
LH: loop header
LB: loop body
LE: loop exit
PB: predicated region body
PF: predicated region fallthrough
CT: control target
= control target key end

     0   :  { %s401_s11 = smov 0   ;;  %s428_s0 = inlined_call_operand.<no memory space> [shape: f32[1], index: 0, kind: input, shape index: {}]   ;;  %s429_s1 = inlined_call_operand.vmem [shape: f32[2,4,256], index: 1, kind: input, shape index: {}]   ;;  %s430_s2 = inlined_call_operand.vmem [shape: f32[2,4,256], index: 2, kind: output, shape index: {}]  }
   0x1   :  { %7 = sst [smem:[#allocation2]] %s428_s0 }
   0x2 LB: > { %s346_s12 = sadd.s32 4294967295, %s381_s11   ;;  %p350_p0 = scmp.ge.s32.totalorder %s381_s11, 1  ;;  %s381_s11 = sphi %s401_s11, %s13_s11  }
   0x3   : > { %p113_p1 = scmp.lt.s32.totalorder %s381_s11, 3 }
   0x5   : > { %p114_p2 = pnand %p350_p0, %p113_p1 }
   0x6   : > { %p135_p3 = scmp.lt.s32.totalorder (!%p114_p2), %s346_s12, 1  ;;  %s274_s16 = sld [smem:[#allocation2]] (!%p114_p2) }
   0x7   : > { %117 = sbr.rel (%p114_p2) target bundleno = 567 (0x237), region = 28 }
   0xc   : > { %s432_s12 = smov (!%p135_p3, %s346_s12), 1  ;;  %vm197_vm0 = vcmask 27648   ;;  %vm229_vm1 = vcmask 1043456   ;;  %vm225_vm6 = vcmask 31744   ;;  %v275_v28 = vstv %s274_s16 }
   0xd   : > { %s361_s0 = sshll.u32 %s432_s12, 3 }
   0xe   : > { %s139_s15 = scalar_lea.vmem %s429_s1, %s361_s0  ;;  %s144_s19 = scalar_lea.vmem %s430_s2, %s361_s0 }
   0xf   : > { %v145_v0 = vld [vmem:[%s139_s15] sm:$0xff] }
  0x10   : > { %147 = vst [vmem:[#allocation1] ss:$2 sm:$0xff] %v145_v0 }
  0x17   : > { %v148_v1 = vld.sshfl [vmem:[#allocation1] sm:$0xff pattern:$0x75316420]  ;;  %v149_v2 = vld.sshfl [vmem:[#allocation1 + $0x8] sm:$0xff pattern:$0x75316420] }
  0x18   : > { %152 = vst [vmem:[#allocation1] ss:$2 sm:$0xff] %v145_v0 }
  0x1f   : > { %v153_v3 = vld.sshfl [vmem:[#allocation1] sm:$0xff pattern:$0x75316420]  ;;  %v154_v4 = vld.sshfl [vmem:[#allocation1 + $0x8] sm:$0xff pattern:$0x75316420] }
  0x20   : > { %172 = vmatpush.xpose.msra.mxu0 %v153_v3  ;;  %192 = vmatpush.xpose.msra.mxu1 %v154_v4  ;;  %222 = vst [vmem:[#allocation1] ss:$2 sm:$0xff] %v145_v0 }
  0x23   : > { %173 = vmatmul.f32.vlgmr.msra.gmra.mxu0 %v148_v1  ;;  %193 = vmatmul.f32.vlgmr.msra.gmra.mxu1 %v149_v2 }
  0x27   : > { %v223_v14 = vld.sshfl [vmem:[#allocation1] sm:$0xff pattern:$0x75316420]  ;;  %v224_v15 = vld.sshfl [vmem:[#allocation1 + $0x8] sm:$0xff pattern:$0x75316420] }
  0x28   : > { %355 = vmatpush.msk.msra.mxu2 %vm229_vm1, %v223_v14  ;;  %357 = vmatpush.msk.msra.mxu3 %vm229_vm1, %v224_v15  ;;  %278 = vst [vmem:[#allocation1] ss:$2 sm:$0xff] %v145_v0 }
  0x2f   : > { %v280_v31 = vld.sshfl [vmem:[#allocation1 + $0x8] sm:$0xff pattern:$0x75316420]  ;;  %v279_v34 = vld.sshfl [vmem:[#allocation1] sm:$0xff pattern:$0x75316420] }
  0xa0   : > { %v174_v5 = vpop.f32.mrf.mxu0  ;;  %v194_v6 = vpop.f32.mrf.mxu1 }
  0xa1   : > { %v195_v7 = vadd.f32 %v194_v6, %v174_v5 }
  0xa3   : > { %v198_v8 = vsel %vm197_vm0, %v195_v7, inf }
  0xa4   : > { %199 = vmin.xlane.f32.xlu0 %v198_v8 }
 0x117   : > { %v200_v9 = vpop.xlane.xlu0 %199 }
 0x118   : > { %v201_v10 = vsub.f32 %v200_v9, %v195_v7 }
 0x11a   : > { %v202_v11 = vmul.f32 1.442695, %v201_v10 }
 0x11c   : > { %371 = vpow2.f32 %v202_v11 }
 0x122   : > { %v372_v12 = vpop.eup %371 }
 0x123   : > { %v204_v13 = vsel %vm197_vm0, %v372_v12, 0.0 }
 0x124   : > { %205 = vadd.xlane.f32.xlu0 %v204_v13 }
 0x197   : > { %v206_v16 = vpop.xlane.xlu0 %205 }
 0x198   : > { %373 = vrcp.f32 %v206_v16  ;;  %v218_v20 = vand.u32 2147483648, %v206_v16  ;;  %v216_v22 = vand.u32 2147483647, %v206_v16  ;;  %vm212_vm3 = vweird.f32 %v206_v16 }
 0x19a   : > { %v219_v24 = vor.u32 1.1754944e-38, %v218_v20  ;;  %vm217_vm5 = vcmp.eq.f32.partialorder %v216_v22, 8.507059e+37 }
 0x19e   : > { %v374_v17 = vpop.eup %373 }
 0x19f   : > { %v208_v18 = vmul.f32 %v374_v17, %v206_v16  ;;  %vm213_vm2 = vweird.f32 %v374_v17 }
 0x1a0   : > { %vm214_vm4 = vmor %vm212_vm3, %vm213_vm2 }
 0x1a1   : > { %v209_v19 = vsub.f32 1.0, %v208_v18 }
 0x1a3   : > { %v210_v21 = vmul.f32 %v374_v17, %v209_v19 }
 0x1a5   : > { %v211_v23 = vadd.f32 %v374_v17, %v210_v21 }
 0x1a7   : > { %v215_v25 = vsel %vm214_vm4, %v374_v17, %v211_v23 }
 0x1a8   : > { %v220_v26 = vsel %vm217_vm5, %v219_v24, %v215_v25 }
 0x1a9   : > { %v221_v27 = vmul.f32 %v372_v12, %v220_v26 }
 0x1ab   : > { %356 = vmatmul.msk.f32.vlgmr.msra.gmra.mxu2 %vm225_vm6, %v221_v27  ;;  %358 = vmatmul.msk.f32.vlgmr.msra.gmra.mxu3 %vm225_vm6, %v221_v27 }
 0x22e   : > { %v251_v29 = vpop.f32.mrf.mxu2  ;;  %v271_v30 = vpop.f32.mrf.mxu3 }
 0x22f   : > { %v276_v32 = vmul.f32 %v275_v28, %v251_v29  ;;  %v277_v33 = vmul.f32 %v275_v28, %v271_v30 }
 0x231   : > { %v284_v35 = vadd.f32 %v280_v31, %v277_v33  ;;  %v283_v36 = vadd.f32 %v279_v34, %v276_v32 }
 0x233   : > { %v287_v37 = vrot.slane %v284_v35, 4 }
 0x235   : > { %v288_v38 = vsel %vm229_vm1, %v283_v36, %v287_v37 }
 0x236   : > { %290 = vst [vmem:[%s144_s19] sm:$0xff] %v288_v38 }
 0x237 PF: > { %s13_s11 = sadd.s32 1, %s381_s11  }
 0x238   : > { %p10_p4 = scmp.ge.s32.totalorder %s13_s11, 4  }
 0x23a   :  { %12 = sbr.rel (!%p10_p4) target bundleno = 2 (0x2), region = 58 }

</bundles_post_ra>
